<compile_context>
chip_gen: v7x
topology: tpu7x:2x2x1
jax: 0.10.0
libtpu: 0.0.40
codegen_flags: <defaults>
</compile_context>

<pallas_src>
import jax
import jax.numpy as jnp
from jax.experimental import pallas as pl
from jax.experimental.pallas import tpu as pltpu


def _round_up(a, m):
    return (a + m - 1) // m * m


def _disc_kernel(x_ref, w1_ref, b1_ref, w2_ref, b2_ref, w3_ref, b3_ref, o_ref):
    def leaky(h):  # LeakyReLU(0.2), f32
        return jnp.maximum(h, 0.2 * h)

    # Linear(96->256) [padded to 128->256] + LeakyReLU
    h = jnp.dot(x_ref[...], w1_ref[...], preferred_element_type=jnp.float32)
    h = leaky(h + b1_ref[...])
    # Linear(256->256) + LeakyReLU
    h = jnp.dot(h.astype(jnp.bfloat16), w2_ref[...],
                preferred_element_type=jnp.float32)
    h = leaky(h + b2_ref[...])
    # Linear(256->1) [padded to 256->128] + Sigmoid
    h = jnp.dot(h.astype(jnp.bfloat16), w3_ref[...],
                preferred_element_type=jnp.float32)
    h = h + b3_ref[...]
    o_ref[...] = (1.0 / (1.0 + jnp.exp(-h))).astype(o_ref.dtype)


def discriminator_forward(x, params):
    """x: (B, 96) float32 -> (B, 1) float32 (sigmoid probabilities)."""
    B, F = x.shape
    assert F == 96, F

    # Batch tile: up to 256 rows, always a multiple of 8 (sublane constraint).
    tm = min(256, _round_up(max(B, 1), 8))
    B_pad = _round_up(B, tm)
    grid = (B_pad // tm,)

    # Pad to lane-dense shapes, cast weights / x to bf16 (f32 accumulation in-kernel).
    xp = jnp.zeros((B_pad, 128), jnp.bfloat16).at[:B, :96].set(
        x.astype(jnp.bfloat16))
    w1 = jnp.zeros((128, 256), jnp.bfloat16).at[:96, :].set(
        params["w1"].astype(jnp.bfloat16))
    b1 = params["b1"].astype(jnp.float32).reshape(1, 256)
    w2 = params["w2"].astype(jnp.bfloat16)
    b2 = params["b2"].astype(jnp.float32).reshape(1, 256)
    w3 = jnp.zeros((256, 128), jnp.bfloat16).at[:, :1].set(
        params["w3"].astype(jnp.bfloat16))
    b3 = jnp.zeros((1, 128), jnp.float32).at[:, :1].set(
        params["b3"].astype(jnp.float32).reshape(1, 1))

    const = lambda shp: pl.BlockSpec(shp, lambda i: (0, 0))  # VMEM-resident
    out = pl.pallas_call(
        _disc_kernel,
        out_shape=jax.ShapeDtypeStruct((B_pad, 128), jnp.float32),
        grid=grid,
        in_specs=[
            pl.BlockSpec((tm, 128), lambda i: (i, 0)),   # x tile (pipelined)
            const((128, 256)), const((1, 256)),          # w1, b1
            const((256, 256)), const((1, 256)),          # w2, b2
            const((256, 128)), const((1, 128)),          # w3, b3
        ],
        out_specs=pl.BlockSpec((tm, 128), lambda i: (i, 0)),
        compiler_params=pltpu.CompilerParams(
            dimension_semantics=("parallel",),
            vmem_limit_bytes=8 << 20,
        ),
    )(xp, w1, b1, w2, b2, w3, b3)
    return out[:B, :1]


def init_params(key):
    """nn.Linear-style init (uniform +-1/sqrt(fan_in)); weights stored (in, out)."""
    ks = jax.random.split(key, 6)

    def lin(kw, kb, fan_in, fan_out):
        bound = 1.0 / jnp.sqrt(fan_in)
        w = jax.random.uniform(kw, (fan_in, fan_out), jnp.float32, -bound, bound)
        b = jax.random.uniform(kb, (1, fan_out), jnp.float32, -bound, bound)
        return w, b

    w1, b1 = lin(ks[0], ks[1], 96, 256)
    w2, b2 = lin(ks[2], ks[3], 256, 256)
    w3, b3 = lin(ks[4], ks[5], 256, 1)
    return {"w1": w1, "b1": b1, "w2": w2, "b2": b2, "w3": w3, "b3": b3}


def _reference(x, p):
    """Pure-JAX reference mirroring the kernel's bf16-in / f32-accumulate numerics."""
    def leaky(h):
        return jnp.maximum(h, 0.2 * h)
    h = jnp.dot(x.astype(jnp.bfloat16), p["w1"].astype(jnp.bfloat16),
                preferred_element_type=jnp.float32) + p["b1"]
    h = leaky(h)
    h = jnp.dot(h.astype(jnp.bfloat16), p["w2"].astype(jnp.bfloat16),
                preferred_element_type=jnp.float32) + p["b2"]
    h = leaky(h)
    h = jnp.dot(h.astype(jnp.bfloat16), p["w3"].astype(jnp.bfloat16),
                preferred_element_type=jnp.float32) + p["b3"]
    return 1.0 / (1.0 + jnp.exp(-h))


if __name__ == "__main__":
    key = jax.random.PRNGKey(0)
    kx, kp = jax.random.split(key)
    B = 8
    x = jax.random.normal(kx, (B, 96), jnp.float32)
    params = init_params(kp)

    out = discriminator_forward(x, params)
    out = jax.block_until_ready(out)

    ref = _reference(x, params)
    assert out.shape == (B, 1), out.shape
    # bf16 operands -> compare against the bf16-consistent reference.
    assert jnp.allclose(out, ref, atol=1e-3, rtol=1e-3), "mismatch vs reference"
    print("KERNEL_OK")
</pallas_src>

<mosaic_0001>
module attributes {stable_mosaic.version = 11 : i64} {
  func.func @_disc_kernel(%arg0: i32, %arg1: memref<8x128xbf16, #tpu.memory_space<vmem>>, %arg2: memref<128x256xbf16, #tpu.memory_space<vmem>>, %arg3: memref<1x256xf32, #tpu.memory_space<vmem>>, %arg4: memref<256x256xbf16, #tpu.memory_space<vmem>>, %arg5: memref<1x256xf32, #tpu.memory_space<vmem>>, %arg6: memref<256x128xbf16, #tpu.memory_space<vmem>>, %arg7: memref<1x128xf32, #tpu.memory_space<vmem>>, %arg8: memref<8x128xf32, #tpu.memory_space<vmem>>) attributes {dimension_semantics = [#tpu.dimension_semantics<parallel>], iteration_bounds = array<i64: 1>, scalar_prefetch = 0 : i64, scratch_operands = 0 : i64, tpu.core_type = #tpu.core_type<tc>, window_params = [{transform_indices = @transform_0, window_bounds = array<i64: 8, 128>}, {pipeline_mode = #tpu.pipeline_mode<synchronous>, transform_indices = @transform_1, window_bounds = array<i64: 128, 256>}, {pipeline_mode = #tpu.pipeline_mode<synchronous>, transform_indices = @transform_2, window_bounds = array<i64: 1, 256>}, {pipeline_mode = #tpu.pipeline_mode<synchronous>, transform_indices = @transform_3, window_bounds = array<i64: 256, 256>}, {pipeline_mode = #tpu.pipeline_mode<synchronous>, transform_indices = @transform_4, window_bounds = array<i64: 1, 256>}, {pipeline_mode = #tpu.pipeline_mode<synchronous>, transform_indices = @transform_5, window_bounds = array<i64: 256, 128>}, {pipeline_mode = #tpu.pipeline_mode<synchronous>, transform_indices = @transform_6, window_bounds = array<i64: 1, 128>}, {transform_indices = @transform_7, window_bounds = array<i64: 8, 128>}]} {
    %c0 = arith.constant 0 : index
    %c0_0 = arith.constant 0 : index
    %0 = vector.load %arg1[%c0, %c0_0] : memref<8x128xbf16, #tpu.memory_space<vmem>>, vector<8x128xbf16>
    %c0_1 = arith.constant 0 : index
    %c0_2 = arith.constant 0 : index
    %1 = vector.load %arg2[%c0_1, %c0_2] : memref<128x256xbf16, #tpu.memory_space<vmem>>, vector<128x256xbf16>
    %cst = arith.constant dense<0.000000e+00> : vector<8x256xf32>
    %2 = tpu.matmul %0, %1, %cst {dimension_numbers = #tpu.dot_dimension_numbers<[1], [0], [0], [1], [0, 0, 1, 1], [], []>} : vector<8x128xbf16>, vector<128x256xbf16>, vector<8x256xf32> -> vector<8x256xf32>
    %c0_3 = arith.constant 0 : index
    %c0_4 = arith.constant 0 : index
    %3 = vector.load %arg3[%c0_3, %c0_4] : memref<1x256xf32, #tpu.memory_space<vmem>>, vector<1x256xf32>
    %4 = vector.broadcast %3 : vector<1x256xf32> to vector<8x256xf32>
    %5 = arith.addf %2, %4 : vector<8x256xf32>
    %cst_5 = arith.constant 2.000000e-01 : f32
    %6 = vector.broadcast %cst_5 : f32 to vector<8x256xf32>
    %7 = arith.mulf %6, %5 : vector<8x256xf32>
    %8 = arith.maximumf %5, %7 : vector<8x256xf32>
    %9 = arith.truncf %8 : vector<8x256xf32> to vector<8x256xbf16>
    %c0_6 = arith.constant 0 : index
    %c0_7 = arith.constant 0 : index
    %10 = vector.load %arg4[%c0_6, %c0_7] : memref<256x256xbf16, #tpu.memory_space<vmem>>, vector<256x256xbf16>
    %cst_8 = arith.constant dense<0.000000e+00> : vector<8x256xf32>
    %11 = tpu.matmul %9, %10, %cst_8 {dimension_numbers = #tpu.dot_dimension_numbers<[1], [0], [0], [1], [0, 0, 1, 1], [], []>} : vector<8x256xbf16>, vector<256x256xbf16>, vector<8x256xf32> -> vector<8x256xf32>
    %c0_9 = arith.constant 0 : index
    %c0_10 = arith.constant 0 : index
    %12 = vector.load %arg5[%c0_9, %c0_10] : memref<1x256xf32, #tpu.memory_space<vmem>>, vector<1x256xf32>
    %13 = vector.broadcast %12 : vector<1x256xf32> to vector<8x256xf32>
    %14 = arith.addf %11, %13 : vector<8x256xf32>
    %cst_11 = arith.constant 2.000000e-01 : f32
    %15 = vector.broadcast %cst_11 : f32 to vector<8x256xf32>
    %16 = arith.mulf %15, %14 : vector<8x256xf32>
    %17 = arith.maximumf %14, %16 : vector<8x256xf32>
    %18 = arith.truncf %17 : vector<8x256xf32> to vector<8x256xbf16>
    %c0_12 = arith.constant 0 : index
    %c0_13 = arith.constant 0 : index
    %19 = vector.load %arg6[%c0_12, %c0_13] : memref<256x128xbf16, #tpu.memory_space<vmem>>, vector<256x128xbf16>
    %cst_14 = arith.constant dense<0.000000e+00> : vector<8x128xf32>
    %20 = tpu.matmul %18, %19, %cst_14 {dimension_numbers = #tpu.dot_dimension_numbers<[1], [0], [0], [1], [0, 0, 1, 1], [], []>} : vector<8x256xbf16>, vector<256x128xbf16>, vector<8x128xf32> -> vector<8x128xf32>
    %c0_15 = arith.constant 0 : index
    %c0_16 = arith.constant 0 : index
    %21 = vector.load %arg7[%c0_15, %c0_16] : memref<1x128xf32, #tpu.memory_space<vmem>>, vector<1x128xf32>
    %22 = vector.broadcast %21 : vector<1x128xf32> to vector<8x128xf32>
    %23 = arith.addf %20, %22 : vector<8x128xf32>
    %cst_17 = arith.constant 0.000000e+00 : f32
    %24 = vector.broadcast %cst_17 : f32 to vector<8x128xf32>
    %25 = arith.subf %24, %23 : vector<8x128xf32>
    %26 = math.exp %25 : vector<8x128xf32>
    %cst_18 = arith.constant 1.000000e+00 : f32
    %27 = vector.broadcast %cst_18 : f32 to vector<8x128xf32>
    %28 = arith.addf %27, %26 : vector<8x128xf32>
    %cst_19 = arith.constant 1.000000e+00 : f32
    %29 = vector.broadcast %cst_19 : f32 to vector<8x128xf32>
    %30 = arith.divf %29, %28 : vector<8x128xf32>
    %c0_20 = arith.constant 0 : index
    %c0_21 = arith.constant 0 : index
    %31 = vector.load %arg8[%c0_20, %c0_21] : memref<8x128xf32, #tpu.memory_space<vmem>>, vector<8x128xf32>
    tpu.vector_store %arg8[%c0_20, %c0_21], %30 {strides = array<i32>} : memref<8x128xf32, #tpu.memory_space<vmem>>, vector<8x128xf32>,
    return
  }
  func.func @transform_0(%arg0: i32) -> (i32, i32) {
    %c0_i32 = arith.constant 0 : i32
    %c0_i32_0 = arith.constant 0 : i32
    return %arg0, %c0_i32 : i32, i32
  }
  func.func @transform_1(%arg0: i32) -> (i32, i32) {
    %c0_i32 = arith.constant 0 : i32
    %c0_i32_0 = arith.constant 0 : i32
    %c0_i32_1 = arith.constant 0 : i32
    return %c0_i32, %c0_i32_0 : i32, i32
  }
  func.func @transform_2(%arg0: i32) -> (i32, i32) {
    %c0_i32 = arith.constant 0 : i32
    %c0_i32_0 = arith.constant 0 : i32
    %c0_i32_1 = arith.constant 0 : i32
    return %c0_i32, %c0_i32_0 : i32, i32
  }
  func.func @transform_3(%arg0: i32) -> (i32, i32) {
    %c0_i32 = arith.constant 0 : i32
    %c0_i32_0 = arith.constant 0 : i32
    %c0_i32_1 = arith.constant 0 : i32
    return %c0_i32, %c0_i32_0 : i32, i32
  }
  func.func @transform_4(%arg0: i32) -> (i32, i32) {
    %c0_i32 = arith.constant 0 : i32
    %c0_i32_0 = arith.constant 0 : i32
    %c0_i32_1 = arith.constant 0 : i32
    return %c0_i32, %c0_i32_0 : i32, i32
  }
  func.func @transform_5(%arg0: i32) -> (i32, i32) {
    %c0_i32 = arith.constant 0 : i32
    %c0_i32_0 = arith.constant 0 : i32
    %c0_i32_1 = arith.constant 0 : i32
    return %c0_i32, %c0_i32_0 : i32, i32
  }
  func.func @transform_6(%arg0: i32) -> (i32, i32) {
    %c0_i32 = arith.constant 0 : i32
    %c0_i32_0 = arith.constant 0 : i32
    %c0_i32_1 = arith.constant 0 : i32
    return %c0_i32, %c0_i32_0 : i32, i32
  }
  func.func @transform_7(%arg0: i32) -> (i32, i32) {
    %c0_i32 = arith.constant 0 : i32
    %c0_i32_0 = arith.constant 0 : i32
    return %arg0, %c0_i32 : i32, i32
  }
}

</mosaic_0001>

<bundles_post_ra>
// kernel: tpu_custom_call.1
= control target key start
LH: loop header
LB: loop body
LE: loop exit
PB: predicated region body
PF: predicated region fallthrough
CT: control target
= control target key end

     0   :  { %12 = vsyncpa [#allocation3], 0  ;;  %s1119_s0 = inlined_call_operand.hbm [shape: bf16[8,128], index: 0, kind: input, shape index: {}]   ;;  %s1120_s1 = inlined_call_operand.hbm [shape: bf16[128,256], index: 1, kind: input, shape index: {}]   ;;  %s1121_s2 = inlined_call_operand.vmem [shape: f32[1,256], index: 2, kind: input, shape index: {}]   ;;  %s1122_s3 = inlined_call_operand.hbm [shape: bf16[256,256], index: 3, kind: input, shape index: {}]   ;;  %s1123_s4 = inlined_call_operand.vmem [shape: f32[1,256], index: 4, kind: input, shape index: {}]   ;;  %s1124_s5 = inlined_call_operand.hbm [shape: bf16[256,128], index: 5, kind: input, shape index: {}]   ;;  %s1125_s6 = inlined_call_operand.vmem [shape: f32[1,128], index: 6, kind: input, shape index: {}]   ;;  %s1126_s7 = inlined_call_operand.hbm [shape: f32[8,128], index: 7, kind: output, shape index: {}]  }
   0x1   :  { %13 = vsyncpa [#allocation6], 0 }
   0x2   :  { %14 = vsyncpa [#allocation9], 0 }
   0x3   :  { %15 = vsyncpa [#allocation4], 0  ;;  %s994_s24 = smov [#allocation5]   ;;  %s876_s28 = scalar_lea.hbm %s1120_s1, 2048 }
   0x4   :  { %s31_s25 = sshll.u32 %s994_s24, 4  ;;  %p877_p0 = scmp.ne.s32.totalorder %s1120_s1, %s876_s28  ;;  %s32_s25 = int_to_ptr.vmem [resolvable:$true] %s31_s25 }
   0x5   :  { %p880_p1 = scmp.lt.u32.totalorder %s876_s28, %s1120_s1 }
   0x7   :  { %p882_p2 = pnand %p880_p1, %p877_p0 }
   0x9   :  { %885 = shalt.err (!%p882_p2)
}
   0xa   :  { %s886_s10 = scalar_lea.vmem %s32_s25, 2048  ;;  %p891_p4 = scmp.lt.s32.totalorder %s32_s25, %s32_s25 }
   0xb   :  { %p887_p3 = scmp.ne.s32.totalorder %s32_s25, %s886_s10  ;;  %p892_p5 = scmp.lt.s32.totalorder %s886_s10, %s886_s10 }
   0xd   :  { %p893_p6 = por %p892_p5, %p891_p4 }
   0xf   :  { %p894_p7 = pnand %p893_p6, %p887_p3 }
  0x11   :  { %897 = shalt.err (!%p894_p7)
}
  0x12   :  { %s995_s11 = smov 128   ;;  %s996_s12 = smov 8  }
  0x13   :  { %37 = dma.hbm_to_vmem [thread:$0]  %s1120_s1, 2048, %s32_s25, [#allocation6], %s995_s11, %s995_s11, %s996_s12  }
  0x14   :  { %s997_s15 = smov [#allocation2]   ;;  %s998_s17 = smov [#allocation7]  }
  0x15   :  { %s22_s16 = sshll.u32 %s997_s15, 4  ;;  %s45_s18 = sshll.u32 %s998_s17, 4  ;;  %s23_s16 = int_to_ptr.vmem [resolvable:$true] %s22_s16  ;;  %s46_s18 = int_to_ptr.vmem [resolvable:$true] %s45_s18 }
  0x16   :  { %s898_s21 = scalar_lea.hbm %s1119_s0, 64 }
  0x17   :  { %p899_p8 = scmp.ne.s32.totalorder %s1119_s0, %s898_s21  ;;  %p902_p9 = scmp.lt.u32.totalorder %s898_s21, %s1119_s0 }
  0x19   :  { %p904_p10 = pnand %p902_p9, %p899_p8 }
  0x1b   :  { %907 = shalt.err (!%p904_p10)
}
  0x1c   :  { %s908_s1 = scalar_lea.vmem %s23_s16, 64  ;;  %p913_p12 = scmp.lt.s32.totalorder %s23_s16, %s23_s16 }
  0x1d   :  { %p909_p11 = scmp.ne.s32.totalorder %s23_s16, %s908_s1  ;;  %p914_p13 = scmp.lt.s32.totalorder %s908_s1, %s908_s1 }
  0x1f   :  { %p915_p0 = por %p914_p13, %p913_p12 }
  0x21   :  { %p916_p1 = pnand %p915_p0, %p909_p11 }
  0x23   :  { %919 = shalt.err (!%p916_p1)
}
  0x24   :  { %25 = dma.hbm_to_vmem [thread:$0]  %s1119_s0, 64, %s23_s16, [#allocation3]  }
  0x25   :  { %s920_s30 = scalar_lea.hbm %s1122_s3, 4096 }
  0x26   :  { %p921_p2 = scmp.ne.s32.totalorder %s1122_s3, %s920_s30  ;;  %p924_p3 = scmp.lt.u32.totalorder %s920_s30, %s1122_s3 }
  0x28   :  { %p926_p4 = pnand %p924_p3, %p921_p2 }
  0x2a   :  { %929 = shalt.err (!%p926_p4)
}
  0x2b   :  { %s930_s14 = scalar_lea.vmem %s46_s18, 4096  ;;  %p935_p6 = scmp.lt.s32.totalorder %s46_s18, %s46_s18 }
  0x2c   :  { %p931_p5 = scmp.ne.s32.totalorder %s46_s18, %s930_s14  ;;  %p936_p7 = scmp.lt.s32.totalorder %s930_s14, %s930_s14 }
  0x2e   :  { %p937_p8 = por %p936_p7, %p935_p6 }
  0x30   :  { %p938_p9 = pnand %p937_p8, %p931_p5 }
  0x32   :  { %941 = shalt.err (!%p938_p9)
}
  0x33   :  { %51 = dma.hbm_to_vmem [thread:$0]  %s1122_s3, 4096, %s46_s18, [#allocation6], %s995_s11, %s995_s11, %s996_s12  }
  0x34   :  { %s999_s16 = smov [#allocation8]   ;;  %s942_s21 = scalar_lea.hbm %s1124_s5, 2048 }
  0x35   :  { %s59_s17 = sshll.u32 %s999_s16, 4  ;;  %p943_p10 = scmp.ne.s32.totalorder %s1124_s5, %s942_s21  ;;  %s60_s17 = int_to_ptr.vmem [resolvable:$true] %s59_s17 }
  0x36   :  { %p946_p11 = scmp.lt.u32.totalorder %s942_s21, %s1124_s5 }
  0x38   :  { %p948_p12 = pnand %p946_p11, %p943_p10 }
  0x3a   :  { %951 = shalt.err (!%p948_p12)
}
  0x3b   :  { %s952_s1 = scalar_lea.vmem %s60_s17, 2048  ;;  %p957_p0 = scmp.lt.s32.totalorder %s60_s17, %s60_s17 }
  0x3c   :  { %p953_p13 = scmp.ne.s32.totalorder %s60_s17, %s952_s1  ;;  %p958_p1 = scmp.lt.s32.totalorder %s952_s1, %s952_s1 }
  0x3e   :  { %p959_p2 = por %p958_p1, %p957_p0 }
  0x40   :  { %p960_p3 = pnand %p959_p2, %p953_p13 }
  0x42   :  { %963 = shalt.err (!%p960_p3)
}
  0x43   :  { %s1000_s3 = smov 64   ;;  %s1001_s11 = smov 4  }
  0x44   :  { %65 = dma.hbm_to_vmem [thread:$0]  %s1124_s5, 2048, %s60_s17, [#allocation9], %s1000_s3, %s1000_s3, %s1001_s11  }
  0x45   :  { %986 = dma.done.wait [#allocation3], 64  }
  0x46   :  { %987 = vsyncadd [#allocation3], 4294967232 }
  0x47   :  { %988 = dma.done.wait [#allocation6], 6144  }
  0x48   :  { %989 = vsyncadd [#allocation6], 4294961152 }
  0x49   :  { %990 = dma.done.wait [#allocation9], 2048  }
  0x4a   :  { %991 = vsyncadd [#allocation9], 4294965248  ;;  %v1002_v0 = vmov 0   ;;  %v784_v1 = vld [vmem:[#allocation5 + $0x4] ss:$8 sps:$4 sm:$0xff]   ;;  %v860_v54 = vld [vmem:[#allocation8 + $0x50] sm:$0xff]   ;;  %v100_v61 = vlaneseq }
  0x4b   :  { %222 = vmatprep.mubr.bf16.mxu0 %v1002_v0  ;;  %v786_v2 = vld [vmem:[#allocation5] ss:$8 sps:$4 sm:$0xff]   ;;  %190 = vmatprep.subr.bf16.mxu0 %v784_v1  ;;  %v787_v3 = vld [vmem:[#allocation5 + $0x14] ss:$8 sps:$4 sm:$0xff]   ;;  %v789_v4 = vld [vmem:[#allocation5 + $0x10] ss:$8 sps:$4 sm:$0xff]  }
  0x4c   :  { %191 = vmatpush1.bf16.msra.mxu0 %v786_v2  ;;  %v790_v5 = vld [vmem:[#allocation5 + $0x24] ss:$8 sps:$4 sm:$0xff]   ;;  %v792_v6 = vld [vmem:[#allocation5 + $0x20] ss:$8 sps:$4 sm:$0xff]   ;;  %v793_v7 = vld [vmem:[#allocation5 + $0x34] ss:$8 sps:$4 sm:$0xff]  }
  0x4d   :  { %192 = vmatprep.subr.bf16.mxu0 %v787_v3  ;;  %v795_v8 = vld [vmem:[#allocation5 + $0x30] ss:$8 sps:$4 sm:$0xff]   ;;  %v796_v9 = vld [vmem:[#allocation5 + $0x44] ss:$8 sps:$4 sm:$0xff]   ;;  %v810_v11 = vld [vmem:[#allocation7] ss:$8 sps:$4 sm:$0xff]  }
  0x4e   :  { %v808_v10 = vld [vmem:[#allocation7 + $0x4] ss:$8 sps:$4 sm:$0xff]   ;;  %v811_v12 = vld [vmem:[#allocation7 + $0x14] ss:$8 sps:$4 sm:$0xff]   ;;  %v798_v13 = vld [vmem:[#allocation5 + $0x40] ss:$8 sps:$4 sm:$0xff]  }
  0x4f   :  { %441 = vmatprep.subr.bf16.mxu1 %v808_v10  ;;  %v813_v14 = vld [vmem:[#allocation7 + $0x10] ss:$8 sps:$4 sm:$0xff]   ;;  %v814_v15 = vld [vmem:[#allocation7 + $0x24] ss:$8 sps:$4 sm:$0xff]   ;;  %v799_v16 = vld [vmem:[#allocation5 + $0x54] ss:$8 sps:$4 sm:$0xff]  }
  0x50   :  { %193 = vmatpush1.bf16.msra.mxu0 %v789_v4  ;;  %442 = vmatpush1.bf16.msra.mxu1 %v810_v11  ;;  %v801_v17 = vld [vmem:[#allocation5 + $0x50] ss:$8 sps:$4 sm:$0xff]   ;;  %v816_v18 = vld [vmem:[#allocation7 + $0x20] ss:$8 sps:$4 sm:$0xff]   ;;  %v817_v19 = vld [vmem:[#allocation7 + $0x34] ss:$8 sps:$4 sm:$0xff]  }
  0x51   :  { %194 = vmatprep.subr.bf16.mxu0 %v790_v5  ;;  %443 = vmatprep.subr.bf16.mxu1 %v811_v12  ;;  %v802_v20 = vld [vmem:[#allocation5 + $0x64] ss:$8 sps:$4 sm:$0xff]   ;;  %v804_v21 = vld [vmem:[#allocation5 + $0x60] ss:$8 sps:$4 sm:$0xff]   ;;  %v819_v22 = vld [vmem:[#allocation7 + $0x30] ss:$8 sps:$4 sm:$0xff]  }
  0x52   :  { %v820_v23 = vld [vmem:[#allocation7 + $0x44] ss:$8 sps:$4 sm:$0xff]   ;;  %v805_v24 = vld [vmem:[#allocation5 + $0x74] ss:$8 sps:$4 sm:$0xff]   ;;  %v807_v25 = vld [vmem:[#allocation5 + $0x70] ss:$8 sps:$4 sm:$0xff]  }
  0x53   :  { %v822_v26 = vld [vmem:[#allocation7 + $0x40] ss:$8 sps:$4 sm:$0xff]   ;;  %v823_v27 = vld [vmem:[#allocation7 + $0x54] ss:$8 sps:$4 sm:$0xff]   ;;  %v825_v29 = vld [vmem:[#allocation7 + $0x50] ss:$8 sps:$4 sm:$0xff]  }
  0x54   :  { %195 = vmatpush1.bf16.msra.mxu0 %v792_v6  ;;  %444 = vmatpush1.bf16.msra.mxu1 %v813_v14  ;;  %v81_v28 = vld [vmem:[#allocation2] sm:$0xf]  ;;  %v826_v30 = vld [vmem:[#allocation7 + $0x64] ss:$8 sps:$4 sm:$0xff]   ;;  %v828_v31 = vld [vmem:[#allocation7 + $0x60] ss:$8 sps:$4 sm:$0xff]  }
  0x55   :  { %196 = vmatprep.subr.bf16.mxu0 %v793_v7  ;;  %445 = vmatprep.subr.bf16.mxu1 %v814_v15  ;;  %v829_v32 = vld [vmem:[#allocation7 + $0x74] ss:$8 sps:$4 sm:$0xff]   ;;  %v831_v33 = vld [vmem:[#allocation7 + $0x70] ss:$8 sps:$4 sm:$0xff]   ;;  %v832_v34 = vld [vmem:[#allocation7 + $0x84] ss:$8 sps:$4 sm:$0xff]  }
  0x56   :  { %v834_v35 = vld [vmem:[#allocation7 + $0x80] ss:$8 sps:$4 sm:$0xff]   ;;  %v835_v36 = vld [vmem:[#allocation7 + $0x94] ss:$8 sps:$4 sm:$0xff]   ;;  %v837_v37 = vld [vmem:[#allocation7 + $0x90] ss:$8 sps:$4 sm:$0xff]  }
  0x57   :  { %v838_v38 = vld [vmem:[#allocation7 + $0xa4] ss:$8 sps:$4 sm:$0xff]   ;;  %v840_v39 = vld [vmem:[#allocation7 + $0xa0] ss:$8 sps:$4 sm:$0xff]   ;;  %v841_v40 = vld [vmem:[#allocation7 + $0xb4] ss:$8 sps:$4 sm:$0xff]  }
  0x58   :  { %197 = vmatpush1.bf16.msra.mxu0 %v795_v8  ;;  %446 = vmatpush1.bf16.msra.mxu1 %v816_v18  ;;  %v843_v41 = vld [vmem:[#allocation7 + $0xb0] ss:$8 sps:$4 sm:$0xff]   ;;  %v844_v42 = vld [vmem:[#allocation7 + $0xc4] ss:$8 sps:$4 sm:$0xff]   ;;  %v846_v43 = vld [vmem:[#allocation7 + $0xc0] ss:$8 sps:$4 sm:$0xff]  }
  0x59   :  { %198 = vmatprep.subr.bf16.mxu0 %v796_v9  ;;  %447 = vmatprep.subr.bf16.mxu1 %v817_v19  ;;  %v847_v44 = vld [vmem:[#allocation7 + $0xd4] ss:$8 sps:$4 sm:$0xff]   ;;  %v849_v45 = vld [vmem:[#allocation7 + $0xd0] ss:$8 sps:$4 sm:$0xff]   ;;  %v850_v46 = vld [vmem:[#allocation7 + $0xe4] ss:$8 sps:$4 sm:$0xff]  }
  0x5a   :  { %v852_v47 = vld [vmem:[#allocation7 + $0xe0] ss:$8 sps:$4 sm:$0xff]   ;;  %v853_v48 = vld [vmem:[#allocation7 + $0xf4] ss:$8 sps:$4 sm:$0xff]   ;;  %v855_v49 = vld [vmem:[#allocation7 + $0xf0] ss:$8 sps:$4 sm:$0xff]  }
  0x5b   :  { %v856_v50 = vld [vmem:[#allocation8 + $0x40] sm:$0xff]   ;;  %v858_v52 = vld [vmem:[#allocation8 + $0x48] sm:$0xff]   ;;  %v861_v55 = vld [vmem:[#allocation8 + $0x10] sm:$0xff]   ;;  %v101_v62 = vshrl.u32 %v100_v61, 7 }
  0x5c   :  { %199 = vmatpush1.bf16.msra.mxu0 %v798_v13  ;;  %448 = vmatpush1.bf16.msra.mxu1 %v819_v22  ;;  %v857_v51 = vld [vmem:[#allocation8] sm:$0xff]   ;;  %v859_v53 = vld [vmem:[#allocation8 + $0x8] sm:$0xff]   ;;  %v862_v56 = vld [vmem:[#allocation8 + $0x58] sm:$0xff]  }
  0x5d   :  { %200 = vmatprep.subr.bf16.mxu0 %v799_v16  ;;  %449 = vmatprep.subr.bf16.mxu1 %v820_v23  ;;  %v863_v57 = vld [vmem:[#allocation8 + $0x18] sm:$0xff]   ;;  %v864_v58 = vld [vmem:[#allocation8 + $0x60] sm:$0xff]   ;;  %v866_v60 = vld [vmem:[#allocation8 + $0x68] sm:$0xff]   ;;  %v102_v63 = vsub.s32 0, %v101_v62  ;;  %v106_v1 = vsub.s32 1, %v101_v62 }
  0x5e   :  { %v865_v59 = vld [vmem:[#allocation8 + $0x20] sm:$0xff]   ;;  %v98_v0 = vld [vmem:[%s1121_s2] sm:$0x3]  ;;  %v867_v16 = vld [vmem:[#allocation8 + $0x28] sm:$0xff]  }
  0x5f   :  { %v103_v2 = vrot.slane %v98_v0, %v102_v63  ;;  %v107_v3 = vrot.slane %v98_v0, %v106_v1  ;;  %v869_v18 = vld [vmem:[#allocation8 + $0x30] sm:$0xff]   ;;  %v870_v19 = vld [vmem:[#allocation8 + $0x78] sm:$0xff]  }
  0x60   :  { %201 = vmatpush1.bf16.msra.mxu0 %v801_v17  ;;  %450 = vmatpush1.bf16.msra.mxu1 %v822_v26  ;;  %v868_v17 = vld [vmem:[#allocation8 + $0x70] sm:$0xff]  }
  0x61   :  { %202 = vmatprep.subr.bf16.mxu0 %v802_v20  ;;  %451 = vmatprep.subr.bf16.mxu1 %v823_v27  ;;  %v871_v20 = vld [vmem:[#allocation8 + $0x38] sm:$0xff]  }
  0x64   :  { %203 = vmatpush1.bf16.msra.mxu0 %v804_v21  ;;  %452 = vmatpush1.bf16.msra.mxu1 %v825_v29  ;;  %v269_v21 = vld [vmem:[%s1123_s4] sm:$0x3]  ;;  %s1003_s4 = smov [#allocation10]  }
  0x65   :  { %204 = vmatprep.subr.bf16.mxu0 %v805_v24  ;;  %453 = vmatprep.subr.bf16.mxu1 %v826_v30  ;;  %v274_v22 = vrot.slane %v269_v21, %v102_v63  ;;  %v278_v23 = vrot.slane %v269_v21, %v106_v1  ;;  %s676_s30 = sshll.u32 %s1003_s4, 4  ;;  %s677_s30 = int_to_ptr.vmem [resolvable:$true] %s676_s30 }
  0x66   :  { %s964_s8 = scalar_lea.vmem %s677_s30, 128  ;;  %p969_p5 = scmp.lt.s32.totalorder %s677_s30, %s677_s30 }
  0x67   :  { %p965_p4 = scmp.ne.s32.totalorder %s677_s30, %s964_s8  ;;  %p970_p6 = scmp.lt.s32.totalorder %s964_s8, %s964_s8 }
  0x68   :  { %205 = vmatpush1.bf16.msra.mxu0 %v807_v25  ;;  %454 = vmatpush1.bf16.msra.mxu1 %v828_v31 }
  0x69   :  { %455 = vmatprep.subr.bf16.mxu1 %v829_v32  ;;  %752 = vmatprep.subr.bf16.mxu0 %v856_v50  ;;  %p971_p7 = por %p970_p6, %p969_p5 }
  0x6b   :  { %223 = vmatmul.mubr.bf16.vlgmr.msra.gmra.mrb[0].mxu0 %v81_v28  ;;  %p972_p8 = pnand %p971_p7, %p965_p4 }
  0x6c   :  { %456 = vmatpush1.bf16.msra.mxu1 %v831_v33  ;;  %753 = vmatpush3.bf16.msra.mxu0 %v857_v51 }
  0x6d   :  { %457 = vmatprep.subr.bf16.mxu1 %v832_v34  ;;  %754 = vmatprep.subr.bf16.mxu0 %v858_v52 }
  0x70   :  { %458 = vmatpush1.bf16.msra.mxu1 %v834_v35  ;;  %755 = vmatpush3.bf16.msra.mxu0 %v859_v53 }
  0x71   :  { %459 = vmatprep.subr.bf16.mxu1 %v835_v36  ;;  %756 = vmatprep.subr.bf16.mxu0 %v860_v54 }
  0x74   :  { %460 = vmatpush1.bf16.msra.mxu1 %v837_v37  ;;  %757 = vmatpush3.bf16.msra.mxu0 %v861_v55  ;;  %v735_v37 = vld [vmem:[%s1125_s6] ss:$0 sm:$0xff] }
  0x75   :  { %461 = vmatprep.subr.bf16.mxu1 %v838_v38  ;;  %758 = vmatprep.subr.bf16.mxu0 %v862_v56 }
  0x78   :  { %462 = vmatpush1.bf16.msra.mxu1 %v840_v39  ;;  %759 = vmatpush3.bf16.msra.mxu0 %v863_v57 }
  0x79   :  { %463 = vmatprep.subr.bf16.mxu1 %v841_v40  ;;  %760 = vmatprep.subr.bf16.mxu0 %v864_v58 }
  0x7c   :  { %464 = vmatpush1.bf16.msra.mxu1 %v843_v41  ;;  %761 = vmatpush3.bf16.msra.mxu0 %v865_v59 }
  0x7d   :  { %465 = vmatprep.subr.bf16.mxu1 %v844_v42  ;;  %762 = vmatprep.subr.bf16.mxu0 %v866_v60 }
  0x80   :  { %466 = vmatpush1.bf16.msra.mxu1 %v846_v43  ;;  %763 = vmatpush3.bf16.msra.mxu0 %v867_v16 }
  0x81   :  { %467 = vmatprep.subr.bf16.mxu1 %v847_v44  ;;  %764 = vmatprep.subr.bf16.mxu0 %v868_v17 }
  0x84   :  { %468 = vmatpush1.bf16.msra.mxu1 %v849_v45  ;;  %765 = vmatpush3.bf16.msra.mxu0 %v869_v18 }
  0x85   :  { %469 = vmatprep.subr.bf16.mxu1 %v850_v46  ;;  %766 = vmatprep.subr.bf16.mxu0 %v870_v19 }
  0x88   :  { %470 = vmatpush1.bf16.msra.mxu1 %v852_v47  ;;  %767 = vmatpush3.bf16.msra.mxu0 %v871_v20 }
  0x89   :  { %471 = vmatprep.subr.bf16.mxu1 %v853_v48 }
  0x8c   :  { %472 = vmatpush1.bf16.msra.mxu1 %v855_v49 }
 0x13e   :  { %v224_v4 = vpop.f32.mrb[0].mxu0 }
 0x13f   :  { %v225_v5 = vadd.f32 %v224_v4, %v103_v2  ;;  %v226_v6 = vpop.f32.mrb[1].mxu0 }
 0x140   :  { %v227_v7 = vadd.f32 %v226_v6, %v107_v3  ;;  %v228_v8 = vpop.f32.mrb[2].mxu0 }
 0x141   :  { %v231_v9 = vmul.f32 0.2, %v225_v5  ;;  %v229_v10 = vpop.f32.mrb[3].mxu0 }
 0x142   :  { %v232_v11 = vmul.f32 0.2, %v227_v7 }
 0x143   :  { %v233_v12 = vmax.f32 %v225_v5, %v231_v9 }
 0x144   :  { %v234_v13 = vmax.f32 %v227_v7, %v232_v11 }
 0x145   :  { %v235_v15 = vpack.c.bf16 %v233_v12, %v233_v12 }
 0x146   :  { %v236_v14 = vpack.c.bf16 %v234_v13, %v234_v13 }
 0x148   :  { %473 = vmatprep.mubr.bf16.mxu1 %v236_v14 }
 0x149   :  { %474 = vmatmul.mubr.bf16.vlgmr.msra.gmra.mrb[0].mxu1 %v235_v15 }
 0x21c   :  { %v475_v24 = vpop.f32.mrb[0].mxu1 }
 0x21d   :  { %v476_v25 = vadd.f32 %v475_v24, %v274_v22  ;;  %v477_v26 = vpop.f32.mrb[1].mxu1 }
 0x21e   :  { %v478_v27 = vadd.f32 %v477_v26, %v278_v23  ;;  %v479_v28 = vpop.f32.mrb[2].mxu1 }
 0x21f   :  { %v482_v29 = vmul.f32 0.2, %v476_v25  ;;  %v480_v30 = vpop.f32.mrb[3].mxu1 }
 0x220   :  { %v483_v31 = vmul.f32 0.2, %v478_v27 }
 0x221   :  { %v484_v32 = vmax.f32 %v476_v25, %v482_v29 }
 0x222   :  { %v485_v33 = vmax.f32 %v478_v27, %v483_v31 }
 0x223   :  { %v486_v35 = vpack.c.bf16 %v484_v32, %v484_v32 }
 0x224   :  { %v487_v34 = vpack.c.bf16 %v485_v33, %v485_v33 }
 0x226   :  { %655 = vmatprep.mubr.bf16.mxu0 %v487_v34 }
 0x227   :  { %656 = vmatmul.mubr.bf16.vlgmr.msra.gmra.mrb[4].mxu0 %v486_v35 }
 0x2fa   :  { %v768_v36 = vpop.f32.mrb[4].mxu0 }
 0x2fb   :  { %v769_v38 = vpop.f32.mrb[5].mxu0 }
 0x2fc   :  { %v770_v39 = vadd.f32 %v769_v38, %v768_v36  ;;  %v771_v40 = vpop.f32.mrb[6].mxu0 }
 0x2fd   :  { %v772_v41 = vpop.f32.mrb[7].mxu0 }
 0x2fe   :  { %v658_v42 = vadd.f32 %v770_v39, %v735_v37 }
 0x300   :  { %v663_v43 = vsub.f32 0.0, %v658_v42 }
 0x302   :  { %v664_v44 = vmul.f32 1.442695, %v663_v43 }
 0x304   :  { %872 = vpow2.f32 %v664_v44 }
 0x30e   :  { %v873_v45 = vpop.eup %872 }
 0x30f   :  { %v666_v46 = vadd.f32 1.0, %v873_v45 }
 0x311   :  { %874 = vrcp.f32 %v666_v46 }
 0x31b   :  { %v875_v47 = vpop.eup %874 }
 0x31c   :  { %669 = vst [vmem:[#allocation10] sm:$0xff] %v875_v47 }
 0x31d   :  { %975 = shalt.err (!%p972_p8)
}
 0x31e   :  { %s976_s10 = scalar_lea.hbm %s1126_s7, 128 }
 0x31f   :  { %p977_p9 = scmp.ne.s32.totalorder %s1126_s7, %s976_s10  ;;  %p980_p10 = scmp.lt.u32.totalorder %s976_s10, %s1126_s7 }
 0x321   :  { %p982_p11 = pnand %p980_p10, %p977_p9 }
 0x323   :  { %985 = shalt.err (!%p982_p11)
}
 0x324   :  { %679 = dma.vmem_to_hbm [thread:$0]  %s677_s30, 128, %s1126_s7, [#allocation4]  }
 0x325   :  { %992 = dma.done.wait [#allocation4], 128  }
 0x326   :  { %993 = vsyncadd [#allocation4], 4294967168 }
 0x327   :  { %683 = vsyncpa [#allocation3], 1 }
 0x328   :  { %684 = vsyncpa [#allocation6], 1 }
 0x329   :  { %685 = vsyncpa [#allocation9], 1 }
 0x32a   :  { %686 = vsyncpa [#allocation4], 1 }

</bundles_post_ra>
